<compile_context>
chip_gen: v6e
topology: v6e:2x2x1
jax: 0.10.0
libtpu: 0.0.40
codegen_flags: <defaults>
</compile_context>

<pallas_src>
import jax
import jax.numpy as jnp
from jax.experimental import pallas as pl
from jax.experimental.pallas import tpu as pltpu

EMB_DIM = 128          # emb_dim default from the module cfg
D_LIG_ATOM = 16        # stand-in for len(map_atom_type_aromatic_to_index)
D_PROT_ATOM = 24       # stand-in for len(atomic_numbers) + 1
N_AA = 20              # stand-in for len(aa_name_number)
MAX_TILE_N = 2048      # node rows per grid step (bf16 out tile = 512 KiB)


# ----------------------------- kernels ---------------------------------------

def _lig_kernel(v_ref, tf_ref, w_atom_ref, w_tf_ref, b_ref, h_ref):
    # h = v @ W_lig + t * w_time + flag * w_ind + (b_lig + b_time + b_ind)
    acc = jnp.dot(v_ref[...], w_atom_ref[...],
                  preferred_element_type=jnp.float32)
    tf = tf_ref[...]                          # [tile, 2] f32: (t, lig_flag)
    wtf = w_tf_ref[...]                       # [2, E]    f32: (w_time; w_ind)
    acc += tf[:, 0:1] * wtf[0:1, :]
    acc += tf[:, 1:2] * wtf[1:2, :]
    acc += b_ref[...]                         # [1, E] folded biases
    h_ref[...] = acc.astype(h_ref.dtype)


def _rec_kernel(v_ref, aa_ref, tf_ref, w_atom_ref, w_res_ref, w_tf_ref,
                b_ref, h_ref):
    # h = v @ W_prot + onehot(aa) @ W_res + t*w_time + flag*w_ind + biases
    acc = jnp.dot(v_ref[...], w_atom_ref[...],
                  preferred_element_type=jnp.float32)
    aa = aa_ref[...]                          # [tile, 1] int32
    n_aa = w_res_ref.shape[0]
    lanes = jax.lax.broadcasted_iota(jnp.int32, (aa.shape[0], n_aa), 1)
    onehot = (aa == lanes).astype(w_res_ref.dtype)     # exact in bf16
    acc += jnp.dot(onehot, w_res_ref[...], preferred_element_type=jnp.float32)
    tf = tf_ref[...]
    wtf = w_tf_ref[...]
    acc += tf[:, 0:1] * wtf[0:1, :]
    acc += tf[:, 1:2] * wtf[1:2, :]
    acc += b_ref[...]
    h_ref[...] = acc.astype(h_ref.dtype)


# --------------------------- parameters --------------------------------------

def init_params(key, emb_dim=EMB_DIM, d_lig=D_LIG_ATOM,
                d_prot=D_PROT_ATOM, n_aa=N_AA):
    ks = jax.random.split(key, 10)

    def lin(k, fan_in, shape):
        bound = 1.0 / float(fan_in) ** 0.5
        return jax.random.uniform(k, shape, jnp.float32, -bound, bound)

    return dict(
        W_lig_atom=lin(ks[0], d_lig, (d_lig, emb_dim)),
        b_lig_atom=lin(ks[1], d_lig, (1, emb_dim)),
        W_prot_atom=lin(ks[2], d_prot, (d_prot, emb_dim)),
        b_prot_atom=lin(ks[3], d_prot, (1, emb_dim)),
        W_res=lin(ks[4], n_aa, (n_aa, emb_dim)),
        b_res=lin(ks[5], n_aa, (1, emb_dim)),
        w_time=lin(ks[6], 1, (1, emb_dim)),
        b_time=lin(ks[7], 1, (1, emb_dim)),
        w_ind=lin(ks[8], 1, (1, emb_dim)),
        b_ind=lin(ks[9], 1, (1, emb_dim)),
    )


# ----------------------------- wrapper ----------------------------------------

def _round_up(x, m):
    return ((x + m - 1) // m) * m


def _pick_tile(n, max_tile=MAX_TILE_N):
    tile = min(max_tile, max(_round_up(n, 16), 16))
    # keep >= 2 grid steps when possible so both v7x TensorCores get work
    if n > 16 and pl.cdiv(n, tile) < 2:
        tile = max(_round_up(pl.cdiv(n, 2), 16), 16)
    return tile


def _node_pallas_call(kernel, inputs, in_specs, n, emb, out_dtype, tile,
                      flops, bytes_accessed):
    return pl.pallas_call(
        kernel,
        out_shape=jax.ShapeDtypeStruct((n, emb), out_dtype),
        grid_spec=pltpu.PrefetchScalarGridSpec(
            num_scalar_prefetch=0,
            grid=(pl.cdiv(n, tile),),
            in_specs=in_specs,
            out_specs=pl.BlockSpec((tile, emb), lambda i: (i, 0)),
        ),
        compiler_params=pltpu.CompilerParams(
            dimension_semantics=("parallel",)),
        cost_estimate=pl.CostEstimate(
            flops=int(flops), transcendentals=0,
            bytes_accessed=int(bytes_accessed)),
    )(*inputs)


def pl_context_encoder(params, x_lig, x_rec, v_lig, v_rec, aa_rec,
                       batch_idx_lig, batch_idx_rec, lig_flag, rec_flag, t,
                       out_dtype=jnp.bfloat16):
    """Returns (x_lig, x_rec, h_lig, h_rec) matching the PyTorch forward."""
    n_lig, d_lig = v_lig.shape
    n_rec, d_prot = v_rec.shape
    emb = params["W_lig_atom"].shape[1]
    n_aa = params["W_res"].shape[0]
    ob = jnp.dtype(out_dtype).itemsize

    # tiny per-node glue identical to the PyTorch forward (timestep gather,
    # flag cast) -- a few bytes per row, left to XLA to fuse/overlap.
    tf_lig = jnp.stack([t[batch_idx_lig].astype(jnp.float32),
                        lig_flag.astype(jnp.float32)], axis=1)      # [N_lig, 2]
    tf_rec = jnp.stack([t[batch_idx_rec].astype(jnp.float32),
                        rec_flag.astype(jnp.float32)], axis=1)      # [N_rec, 2]

    # fold shared time / ligand-indicator weights and all biases once
    w_tf = jnp.concatenate([params["w_time"], params["w_ind"]],
                           axis=0).astype(jnp.float32)              # [2, E]
    b_shared = params["b_time"] + params["b_ind"]
    b_lig = (params["b_lig_atom"] + b_shared).astype(jnp.float32)   # [1, E]
    b_rec = (params["b_prot_atom"] + params["b_res"]
             + b_shared).astype(jnp.float32)                        # [1, E]

    w_lig_atom = params["W_lig_atom"].astype(jnp.bfloat16)
    w_prot_atom = params["W_prot_atom"].astype(jnp.bfloat16)
    w_res = params["W_res"].astype(jnp.bfloat16)

    # ---- ligand nodes --------------------------------------------------------
    tl = _pick_tile(n_lig)
    h_lig = _node_pallas_call(
        _lig_kernel,
        inputs=(v_lig.astype(jnp.bfloat16), tf_lig, w_lig_atom, w_tf, b_lig),
        in_specs=[
            pl.BlockSpec((tl, d_lig), lambda i: (i, 0)),     # node tile (bf16)
            pl.BlockSpec((tl, 2), lambda i: (i, 0)),         # (t, flag) f32
            pl.BlockSpec((d_lig, emb), lambda i: (0, 0)),    # resident weights
            pl.BlockSpec((2, emb), lambda i: (0, 0)),
            pl.BlockSpec((1, emb), lambda i: (0, 0)),
        ],
        n=n_lig, emb=emb, out_dtype=out_dtype, tile=tl,
        flops=2 * n_lig * d_lig * emb + 4 * n_lig * emb,
        bytes_accessed=n_lig * (2 * d_lig + 8 + ob * emb)
        + 2 * d_lig * emb + 12 * emb)

    # ---- receptor nodes ------------------------------------------------------
    tr = _pick_tile(n_rec)
    h_rec = _node_pallas_call(
        _rec_kernel,
        inputs=(v_rec.astype(jnp.bfloat16), aa_rec.astype(jnp.int32)[:, None],
                tf_rec, w_prot_atom, w_res, w_tf, b_rec),
        in_specs=[
            pl.BlockSpec((tr, d_prot), lambda i: (i, 0)),    # node tile (bf16)
            pl.BlockSpec((tr, 1), lambda i: (i, 0)),         # aa index (int32)
            pl.BlockSpec((tr, 2), lambda i: (i, 0)),         # (t, flag) f32
            pl.BlockSpec((d_prot, emb), lambda i: (0, 0)),   # resident weights
            pl.BlockSpec((n_aa, emb), lambda i: (0, 0)),
            pl.BlockSpec((2, emb), lambda i: (0, 0)),
            pl.BlockSpec((1, emb), lambda i: (0, 0)),
        ],
        n=n_rec, emb=emb, out_dtype=out_dtype, tile=tr,
        flops=2 * n_rec * (d_prot + n_aa) * emb + 4 * n_rec * emb,
        bytes_accessed=n_rec * (2 * d_prot + 4 + 8 + ob * emb)
        + 2 * (d_prot + n_aa) * emb + 12 * emb)

    return x_lig, x_rec, h_lig, h_rec


# ------------------------- pure-JAX reference ---------------------------------

def _reference(params, x_lig, x_rec, v_lig, v_rec, aa_rec,
               batch_idx_lig, batch_idx_rec, lig_flag, rec_flag, t):
    hp = jax.lax.Precision.HIGHEST
    t_lig = t[batch_idx_lig].astype(jnp.float32)[:, None]
    t_rec = t[batch_idx_rec].astype(jnp.float32)[:, None]
    h_lig = jnp.dot(v_lig.astype(jnp.float32), params["W_lig_atom"],
                    precision=hp) + params["b_lig_atom"]
    h_rec = jnp.dot(v_rec.astype(jnp.float32), params["W_prot_atom"],
                    precision=hp) + params["b_prot_atom"]
    h_aa = jnp.dot(jax.nn.one_hot(aa_rec, params["W_res"].shape[0],
                                  dtype=jnp.float32),
                   params["W_res"], precision=hp) + params["b_res"]
    te_l = t_lig * params["w_time"] + params["b_time"]
    te_r = t_rec * params["w_time"] + params["b_time"]
    bi_l = lig_flag.astype(jnp.float32)[:, None] * params["w_ind"] + params["b_ind"]
    bi_r = rec_flag.astype(jnp.float32)[:, None] * params["w_ind"] + params["b_ind"]
    return x_lig, x_rec, h_lig + te_l + bi_l, h_rec + te_r + h_aa + bi_r


# ------------------------------ main ------------------------------------------

if __name__ == "__main__":
    key = jax.random.PRNGKey(0)
    (k_par, k_xl, k_xr, k_vl, k_vr,
     k_aa, k_bl, k_br, k_t) = jax.random.split(key, 9)

    B = 2
    N_LIG, N_REC = 16, 32

    params = init_params(k_par)

    x_lig = jax.random.normal(k_xl, (N_LIG, 3), jnp.float32)
    x_rec = jax.random.normal(k_xr, (N_REC, 3), jnp.float32)
    v_lig = jax.random.normal(k_vl, (N_LIG, D_LIG_ATOM), jnp.float32)
    v_rec = jax.random.normal(k_vr, (N_REC, D_PROT_ATOM), jnp.float32)
    aa_rec = jax.random.randint(k_aa, (N_REC,), 0, N_AA, jnp.int32)
    batch_idx_lig = jax.random.randint(k_bl, (N_LIG,), 0, B, jnp.int32)
    batch_idx_rec = jax.random.randint(k_br, (N_REC,), 0, B, jnp.int32)
    lig_flag = jnp.ones((N_LIG,), jnp.int32)
    rec_flag = jnp.zeros((N_REC,), jnp.int32)
    t = jax.random.uniform(k_t, (B,), jnp.float32)

    out = pl_context_encoder(params, x_lig, x_rec, v_lig, v_rec, aa_rec,
                             batch_idx_lig, batch_idx_rec,
                             lig_flag, rec_flag, t)
    out = jax.block_until_ready(out)

    ref = _reference(params, x_lig, x_rec, v_lig, v_rec, aa_rec,
                     batch_idx_lig, batch_idx_rec, lig_flag, rec_flag, t)

    assert out[2].shape == (N_LIG, EMB_DIM) and out[2].dtype == jnp.bfloat16
    assert out[3].shape == (N_REC, EMB_DIM) and out[3].dtype == jnp.bfloat16
    assert jnp.allclose(out[0], ref[0]) and jnp.allclose(out[1], ref[1])
    # bf16 activations / bf16 output vs f32 reference -> relaxed tolerance
    assert jnp.allclose(out[2].astype(jnp.float32), ref[2], atol=3e-2, rtol=3e-2)
    assert jnp.allclose(out[3].astype(jnp.float32), ref[3], atol=3e-2, rtol=3e-2)

    print("KERNEL_OK")
</pallas_src>

<mosaic_0001>
module attributes {stable_mosaic.version = 11 : i64} {
  func.func @_lig_kernel(%arg0: i32, %arg1: memref<16x16xbf16, #tpu.memory_space<vmem>>, %arg2: memref<16x2xf32, #tpu.memory_space<vmem>>, %arg3: memref<16x128xbf16, #tpu.memory_space<vmem>>, %arg4: memref<2x128xf32, #tpu.memory_space<vmem>>, %arg5: memref<1x128xf32, #tpu.memory_space<vmem>>, %arg6: memref<16x128xbf16, #tpu.memory_space<vmem>>) attributes {dimension_semantics = [#tpu.dimension_semantics<parallel>], iteration_bounds = array<i64: 1>, scalar_prefetch = 0 : i64, scratch_operands = 0 : i64, tpu.core_type = #tpu.core_type<tc>, window_params = [{transform_indices = @transform_0, window_bounds = array<i64: 16, 16>}, {transform_indices = @transform_1, window_bounds = array<i64: 16, 2>}, {pipeline_mode = #tpu.pipeline_mode<synchronous>, transform_indices = @transform_2, window_bounds = array<i64: 16, 128>}, {pipeline_mode = #tpu.pipeline_mode<synchronous>, transform_indices = @transform_3, window_bounds = array<i64: 2, 128>}, {pipeline_mode = #tpu.pipeline_mode<synchronous>, transform_indices = @transform_4, window_bounds = array<i64: 1, 128>}, {transform_indices = @transform_5, window_bounds = array<i64: 16, 128>}]} {
    %c0 = arith.constant 0 : index
    %c0_0 = arith.constant 0 : index
    %0 = vector.load %arg1[%c0, %c0_0] : memref<16x16xbf16, #tpu.memory_space<vmem>>, vector<16x16xbf16>
    %c0_1 = arith.constant 0 : index
    %c0_2 = arith.constant 0 : index
    %1 = vector.load %arg3[%c0_1, %c0_2] : memref<16x128xbf16, #tpu.memory_space<vmem>>, vector<16x128xbf16>
    %cst = arith.constant dense<0.000000e+00> : vector<16x128xf32>
    %2 = tpu.matmul %0, %1, %cst {dimension_numbers = #tpu.dot_dimension_numbers<[1], [0], [0], [1], [0, 0, 1, 1], [], []>} : vector<16x16xbf16>, vector<16x128xbf16>, vector<16x128xf32> -> vector<16x128xf32>
    %c0_3 = arith.constant 0 : index
    %c0_4 = arith.constant 0 : index
    %3 = vector.load %arg2[%c0_3, %c0_4] : memref<16x2xf32, #tpu.memory_space<vmem>>, vector<16x2xf32>
    %c0_5 = arith.constant 0 : index
    %c0_6 = arith.constant 0 : index
    %4 = vector.load %arg4[%c0_5, %c0_6] : memref<2x128xf32, #tpu.memory_space<vmem>>, vector<2x128xf32>
    %5 = vector.extract_strided_slice %3 {offsets = [0, 0], sizes = [16, 1], strides = [1, 1]} : vector<16x2xf32> to vector<16x1xf32>
    %6 = vector.extract_strided_slice %4 {offsets = [0, 0], sizes = [1, 128], strides = [1, 1]} : vector<2x128xf32> to vector<1x128xf32>
    %7 = vector.broadcast %5 : vector<16x1xf32> to vector<16x128xf32>
    %8 = vector.broadcast %6 : vector<1x128xf32> to vector<16x128xf32>
    %9 = arith.mulf %7, %8 : vector<16x128xf32>
    %10 = arith.addf %2, %9 : vector<16x128xf32>
    %11 = vector.extract_strided_slice %3 {offsets = [0, 1], sizes = [16, 1], strides = [1, 1]} : vector<16x2xf32> to vector<16x1xf32>
    %12 = vector.extract_strided_slice %4 {offsets = [1, 0], sizes = [1, 128], strides = [1, 1]} : vector<2x128xf32> to vector<1x128xf32>
    %13 = vector.broadcast %11 : vector<16x1xf32> to vector<16x128xf32>
    %14 = vector.broadcast %12 : vector<1x128xf32> to vector<16x128xf32>
    %15 = arith.mulf %13, %14 : vector<16x128xf32>
    %16 = arith.addf %10, %15 : vector<16x128xf32>
    %c0_7 = arith.constant 0 : index
    %c0_8 = arith.constant 0 : index
    %17 = vector.load %arg5[%c0_7, %c0_8] : memref<1x128xf32, #tpu.memory_space<vmem>>, vector<1x128xf32>
    %18 = vector.broadcast %17 : vector<1x128xf32> to vector<16x128xf32>
    %19 = arith.addf %16, %18 : vector<16x128xf32>
    %20 = arith.truncf %19 : vector<16x128xf32> to vector<16x128xbf16>
    %c0_9 = arith.constant 0 : index
    %c0_10 = arith.constant 0 : index
    %21 = vector.load %arg6[%c0_9, %c0_10] : memref<16x128xbf16, #tpu.memory_space<vmem>>, vector<16x128xbf16>
    tpu.vector_store %arg6[%c0_9, %c0_10], %20 {strides = array<i32>} : memref<16x128xbf16, #tpu.memory_space<vmem>>, vector<16x128xbf16>,
    return
  }
  func.func @transform_0(%arg0: i32) -> (i32, i32) {
    %c0_i32 = arith.constant 0 : i32
    %c0_i32_0 = arith.constant 0 : i32
    return %arg0, %c0_i32 : i32, i32
  }
  func.func @transform_1(%arg0: i32) -> (i32, i32) {
    %c0_i32 = arith.constant 0 : i32
    %c0_i32_0 = arith.constant 0 : i32
    return %arg0, %c0_i32 : i32, i32
  }
  func.func @transform_2(%arg0: i32) -> (i32, i32) {
    %c0_i32 = arith.constant 0 : i32
    %c0_i32_0 = arith.constant 0 : i32
    %c0_i32_1 = arith.constant 0 : i32
    return %c0_i32, %c0_i32_0 : i32, i32
  }
  func.func @transform_3(%arg0: i32) -> (i32, i32) {
    %c0_i32 = arith.constant 0 : i32
    %c0_i32_0 = arith.constant 0 : i32
    %c0_i32_1 = arith.constant 0 : i32
    return %c0_i32, %c0_i32_0 : i32, i32
  }
  func.func @transform_4(%arg0: i32) -> (i32, i32) {
    %c0_i32 = arith.constant 0 : i32
    %c0_i32_0 = arith.constant 0 : i32
    %c0_i32_1 = arith.constant 0 : i32
    return %c0_i32, %c0_i32_0 : i32, i32
  }
  func.func @transform_5(%arg0: i32) -> (i32, i32) {
    %c0_i32 = arith.constant 0 : i32
    %c0_i32_0 = arith.constant 0 : i32
    return %arg0, %c0_i32 : i32, i32
  }
}

</mosaic_0001>

<bundles_post_ra>
// kernel: tpu_custom_call.1
= control target key start
LH: loop header
LB: loop body
LE: loop exit
PB: predicated region body
PF: predicated region fallthrough
CT: control target
= control target key end

     0   :  { %v207_v1 = vmov 0.0   ;;  %vm208_vm0 = vmmov 0   ;;  %vm56_vm1 = vcmask 130048   ;;  %v209_v4 = vmov 0   ;;  %s265_s0 = inlined_call_operand.vmem [shape: bf16[16,16], index: 0, kind: input, shape index: {}]   ;;  %s266_s1 = inlined_call_operand.vmem [shape: f32[16,2], index: 1, kind: input, shape index: {}]   ;;  %s267_s2 = inlined_call_operand.vmem [shape: bf16[16,128], index: 2, kind: input, shape index: {}]   ;;  %s268_s3 = inlined_call_operand.vmem [shape: f32[2,128], index: 3, kind: input, shape index: {}]   ;;  %s269_s4 = inlined_call_operand.vmem [shape: f32[1,128], index: 4, kind: input, shape index: {}]   ;;  %s270_s5 = inlined_call_operand.hbm [shape: bf16[16,128], index: 5, kind: output, shape index: {}]  }
   0x1   :  { %v183_v0 = vld [vmem:[%s267_s2] sm:$0xff]   ;;  %167 = vmatprep.subr.bf16.mxu0 %v207_v1  ;;  %169 = vmatprep.mubr.msk.bf16.mxu0 %vm208_vm0, %v207_v1  ;;  %v210_v5 = vmov 1  }
   0x2   :  { %v184_v2 = vld [vmem:[%s265_s0] sm:$0xff]   ;;  %168 = vmatpush3.bf16.msra.mxu0 %v183_v0  ;;  %180 = vset.pattern.permute.xlu0 %v209_v4 }
   0x3   :  { %v26_v3 = vld [vmem:[%s266_s1] sm:$0xff]  ;;  %181 = vset.pattern.permute.xlu1 %v210_v5 }
   0x4   :  { %10 = vsyncpa [#allocation3], 0  ;;  %31 = vperm.xlu0 %180, %v26_v3   ;;  %102 = vperm.xlu1 %181, %v26_v3   ;;  %v27_v6 = vld [vmem:[%s266_s1 + $0x8] sm:$0xff]  ;;  %v39_v7 = vlaneseq  ;;  %v28_v10 = vld [vmem:[%s268_s3] sm:$0x3]  ;;  %s211_s3 = smov [#allocation2]  }
   0x5   :  { %170 = vmatmul.mubr.msk.bf16.vlgmr.msra.gmra.mxu0 %vm56_vm1, %v184_v2  ;;  %v155_v28 = vld [vmem:[%s269_s4] ss:$0 sm:$0xff]  ;;  %s141_s27 = sshll.u32 %s211_s3, 4  ;;  %s142_s27 = int_to_ptr.vmem [resolvable:$true] %s141_s27 }
   0x6   :  { %v40_v8 = vshrl.u32 %v39_v7, 7  ;;  %s185_s28 = scalar_lea.vmem %s142_s27, 128  ;;  %p190_p1 = scmp.lt.s32.totalorder %s142_s27, %s142_s27 }
   0x7   :  { %p186_p0 = scmp.ne.s32.totalorder %s142_s27, %s185_s28  ;;  %p191_p2 = scmp.lt.s32.totalorder %s185_s28, %s185_s28 }
   0x8   :  { %36 = vperm.xlu0 %180, %v27_v6   ;;  %106 = vperm.xlu1 %181, %v27_v6   ;;  %v41_v9 = vsub.s32 0, %v40_v8  ;;  %v111_v12 = vsub.s32 1, %v40_v8 }
   0x9   :  { %p192_p3 = por %p191_p2, %p190_p1 }
   0xa   :  { %v42_v11 = vrot.slane %v28_v10, %v41_v9  ;;  %v112_v16 = vrot.slane %v28_v10, %v111_v12 }
   0xb   :  { %p193_p4 = pnand %p192_p3, %p186_p0 }
   0xc   :  { %182 = vset.pattern.permute.xlu0 %v210_v5 }
  0x7f   :  { %v32_v13 = vpop.permute.xlu0 %31  ;;  %v103_v14 = vpop.permute.xlu1 %102 }
  0x80   :  { %v43_v15 = vmul.f32 %v42_v11, %v32_v13  ;;  %v113_v19 = vmul.f32 %v112_v16, %v103_v14 }
  0x83   :  { %v37_v17 = vpop.permute.xlu0 %36  ;;  %v107_v21 = vpop.permute.xlu1 %106 }
  0x84   :  { %v44_v23 = vmul.f32 %v42_v11, %v37_v17  ;;  %v114_v25 = vmul.f32 %v112_v16, %v107_v21 }
  0xc5   :  { %v94_v18 = vpop.f32.mrf.mxu0 }
  0xc6   :  { %v95_v20 = vadd.f32 %v94_v18, %v43_v15 }
  0xc7   :  { %v171_v22 = vpop.f32.mrf.mxu0 }
  0xc8   :  { %v115_v26 = vadd.f32 %v113_v19, %v95_v20 }
  0xc9   :  { %v97_v24 = vpop.f32.mrf.mxu0 }
  0xca   :  { %v98_v27 = vadd.f32 %v97_v24, %v44_v23  ;;  %v124_v31 = vadd.f32 %v155_v28, %v115_v26 }
  0xcb   :  { %v172_v29 = vpop.f32.mrf.mxu0 }
  0xcc   :  { %v116_v30 = vadd.f32 %v114_v25, %v98_v27 }
  0xce   :  { %v125_v32 = vadd.f32 %v155_v28, %v116_v30 }
  0xd0   :  { %v163_v33 = vpack.c.bf16 %v125_v32, %v124_v31 }
  0xd2   :  { %164 = vst [vmem:[#allocation2] sm:$0xff] %v163_v33  }
  0xd3   :  { %196 = shalt.err (!%p193_p4)
}
  0xd4   :  { %s212_s29 = smov 64   ;;  %s213_s30 = smov 4  }
  0xd5   :  { %147 = dma.vmem_to_hbm [thread:$0]  %s142_s27, 128, %s270_s5, [#allocation3], %s212_s29, %s212_s29, %s213_s30  }
  0xd6   :  { %205 = dma.done.wait [#allocation3], 128  }
  0xd7   :  { %206 = vsyncadd [#allocation3], 4294967168 }
  0xd8   :  { %151 = vsyncpa [#allocation3], 1 }

</bundles_post_ra>
